<compile_context>
chip_gen: v7x
topology: tpu7x:2x2x1
jax: 0.10.0
libtpu: 0.0.40
codegen_flags: <defaults>
</compile_context>

<pallas_src>
import functools

import jax
import jax.numpy as jnp
from jax.experimental import pallas as pl
from jax.experimental.pallas import tpu as pltpu


def _round_up(x, m):
    return (x + m - 1) // m * m


def _cdiv(a, b):
    return -(-a // b)


def _conv2d_kernel(w_ref, b_ref, x_ref, o_ref, *, kh, kw):
    """One grid step: B lane-packed groups of images.

    w_ref: (kh*kw,) f32 in SMEM (flattened kernel, shared across steps).
    b_ref: (1,)     f32 in SMEM.
    x_ref: (B, Hp, Wp) f32 in VMEM -- each (Hp, Wp) slab holds P images packed
           side-by-side along lanes (slot width Ws), zero-padded.
    o_ref: (B, Hop, Wp) f32 in VMEM -- packed/padded outputs.
    """
    B, Hop, Wp = o_ref.shape
    # Hoist the scalar SMEM loads out of the unrolled MAC loops.
    ws = [w_ref[i] for i in range(kh * kw)]
    bias = b_ref[0]
    # Static unroll over the B lane-groups of this block; all heavy work is
    # full-width (Hop, Wp) VPU ops, so this emits the same instruction stream
    # a 3-D formulation would while keeping the lane rolls 2-D.
    for b in range(B):
        acc = None
        for di in range(kh):
            # One row-slab load per kernel row (kh loads per group).  di>0
            # starts at a non-8 sublane offset; Mosaic relayouts it -- VALU,
            # not loads/XLU, is the binding slot for a 3x3 f32 conv.
            rows = x_ref[b, di:di + Hop, :]
            for dj in range(kw):
                # Column shifts via an XLU lane-rotate (left-shift by dj)
                # instead of unaligned loads.  Wrapped / cross-slot lanes land
                # at columns >= Ws - dj >= Wo of every slot and are sliced off
                # by the wrapper.
                shifted = rows if dj == 0 else pltpu.roll(
                    rows, shift=Wp - dj, axis=1)
                term = shifted * ws[di * kw + dj]
                # Bias folded into the first MAC (saves one full-tile add).
                acc = (term + bias) if acc is None else (acc + term)
        o_ref[b] = acc  # full-tile, lane-dense, unmasked store


def conv2d_forward_batched(x, weight, bias, *, block_groups=8):
    """corr2d(x[n], weight) + bias for a batch of 2-D images x: (N, H, W)."""
    N, H, W = x.shape
    kh, kw = weight.shape
    Ho, Wo = H - kh + 1, W - kw + 1

    # --- Lane packing: P images side-by-side per 128-lane row. -------------
    P = max(1, 128 // W)
    Ws = max(W, 128 // P)             # slot width per image
    # Roll-wrap safety: for output col c < Wo and shift dj <= kw-1 we read
    # col c + dj <= W - 1 < Ws, i.e. never leave the image's own slot.
    assert Ws >= W
    Wp = _round_up(P * Ws, 128)       # lane-dense packed width

    Hop = _round_up(Ho, 8)            # sublane-dense output rows
    Hp = _round_up(Hop + kh - 1, 8)   # enough rows for every shifted slab

    # --- Batch blocking over lane-groups of P images. ----------------------
    G = _cdiv(N, P)                               # number of lane-groups
    B = min(block_groups, G)
    steps = max(2, _cdiv(G, B)) if G >= 2 else 1  # >=2 steps for megacore
    B = _cdiv(G, steps)
    steps = _cdiv(G, B)
    G_pad = steps * B
    N_pad = G_pad * P

    # --- Pack: (N, H, W) -> (G_pad, Hp, Wp); image n = g*P + p sits in
    # lanes [p*Ws, p*Ws + W) of group g.  Single pad + one layout op in.
    x_p = jnp.pad(x.astype(jnp.float32),
                  ((0, N_pad - N), (0, Hp - H), (0, Ws - W)))
    x_p = (x_p.reshape(G_pad, P, Hp, Ws)
              .transpose(0, 2, 1, 3)
              .reshape(G_pad, Hp, P * Ws))
    if P * Ws < Wp:
        x_p = jnp.pad(x_p, ((0, 0), (0, 0), (0, Wp - P * Ws)))

    w_flat = weight.astype(jnp.float32).reshape(-1)
    b_vec = bias.astype(jnp.float32).reshape(-1)

    kernel = functools.partial(_conv2d_kernel, kh=kh, kw=kw)

    in_block_bytes = B * Hp * Wp * 4
    out_block_bytes = B * Hop * Wp * 4
    # 2x for double-buffered input/output blocks + headroom; safe on v5e's
    # 16 MiB scoped default and v7x's 64 MiB physical VMEM.
    vmem_limit = min(2 * (in_block_bytes + out_block_bytes) + (8 << 20),
                     64 << 20)
    cost = pl.CostEstimate(
        flops=2 * N * Ho * Wo * kh * kw,
        transcendentals=0,
        bytes_accessed=G_pad * (Hp + Hop) * Wp * 4 + (kh * kw + 1) * 4,
    )

    out_p = pl.pallas_call(
        kernel,
        out_shape=jax.ShapeDtypeStruct((G_pad, Hop, Wp), jnp.float32),
        grid=(steps,),
        in_specs=[
            pl.BlockSpec(memory_space=pltpu.MemorySpace.SMEM),  # weight
            pl.BlockSpec(memory_space=pltpu.MemorySpace.SMEM),  # bias
            pl.BlockSpec((B, Hp, Wp), lambda i: (i, 0, 0)),     # B groups/step
        ],
        out_specs=pl.BlockSpec((B, Hop, Wp), lambda i: (i, 0, 0)),
        compiler_params=pltpu.CompilerParams(
            dimension_semantics=("parallel",),
            vmem_limit_bytes=vmem_limit,
        ),
        cost_estimate=cost,
    )(w_flat, b_vec, x_p)

    # --- Unpack: (G_pad, Hop, Wp) -> (N, Ho, Wo); one layout op out. -------
    out_p = (out_p[:, :, :P * Ws]
             .reshape(G_pad, Hop, P, Ws)
             .transpose(0, 2, 1, 3)
             .reshape(G_pad * P, Hop, Ws))
    return out_p[:N, :Ho, :Wo]


def conv2d_forward(x, weight, bias):
    """Pallas equivalent of Conv2D.forward for a single 2-D image (H, W)."""
    return conv2d_forward_batched(x[None], weight, bias)[0]


def _corr2d_ref(x, k):
    """Pure-JAX reference of the PyTorch corr2d (sanity check)."""
    kh, kw = k.shape
    Ho, Wo = x.shape[0] - kh + 1, x.shape[1] - kw + 1
    out = jnp.zeros((Ho, Wo), jnp.float32)
    for di in range(kh):
        for dj in range(kw):
            out = out + x[di:di + Ho, dj:dj + Wo].astype(jnp.float32) * k[di, dj]
    return out


if __name__ == "__main__":
    key = jax.random.PRNGKey(0)
    k_x, k_w = jax.random.split(key)

    # Small shapes consistent with the module (single-channel 2-D images).
    # N=32 so lane packing (8 images/row) and batch blocking (grid=2) both
    # get exercised.
    N, H, W = 32, 16, 16
    kernel_size = (3, 3)

    x_batch = jax.random.normal(k_x, (N, H, W), dtype=jnp.float32)
    # nn.Parameter(torch.rand(kernel_size)) -> uniform [0, 1)
    weight = jax.random.uniform(k_w, kernel_size, dtype=jnp.float32)
    # nn.Parameter(torch.zeros(1))
    bias = jnp.zeros((1,), dtype=jnp.float32)

    # Batched path (one pallas_call for all images).
    y_batch = jax.block_until_ready(conv2d_forward_batched(x_batch, weight, bias))

    # Single-image path matching the module's forward exactly.
    y_single = jax.block_until_ready(conv2d_forward(x_batch[0], weight, bias))

    Ho, Wo = H - kernel_size[0] + 1, W - kernel_size[1] + 1
    ref_batch = jnp.stack(
        [_corr2d_ref(x_batch[i], weight) + bias[0] for i in range(N)]
    )

    assert y_batch.shape == (N, Ho, Wo)
    assert y_single.shape == (Ho, Wo)
    assert jnp.allclose(y_batch, ref_batch, atol=1e-5, rtol=1e-5)
    assert jnp.allclose(y_single, ref_batch[0], atol=1e-5, rtol=1e-5)

    print("KERNEL_OK")
</pallas_src>

<mosaic_0001>
module attributes {stable_mosaic.version = 11 : i64} {
  func.func @_conv2d_kernel(%arg0: i32, %arg1: memref<9xf32, #tpu.memory_space<smem>>, %arg2: memref<1xf32, #tpu.memory_space<smem>>, %arg3: memref<2x24x128xf32, #tpu.memory_space<vmem>>, %arg4: memref<2x16x128xf32, #tpu.memory_space<vmem>>) attributes {dimension_semantics = [#tpu.dimension_semantics<parallel>], iteration_bounds = array<i64: 2>, scalar_prefetch = 0 : i64, scratch_operands = 0 : i64, tpu.core_type = #tpu.core_type<tc>, window_params = [{transform_indices = @transform_0, window_bounds = array<i64: 9>}, {transform_indices = @transform_1, window_bounds = array<i64: 1>}, {transform_indices = @transform_2, window_bounds = array<i64: 2, 24, 128>}, {transform_indices = @transform_3, window_bounds = array<i64: 2, 16, 128>}]} {
    %c0 = arith.constant 0 : index
    %0 = memref.load %arg1[%c0] : memref<9xf32, #tpu.memory_space<smem>>
    %c1 = arith.constant 1 : index
    %1 = memref.load %arg1[%c1] : memref<9xf32, #tpu.memory_space<smem>>
    %c2 = arith.constant 2 : index
    %2 = memref.load %arg1[%c2] : memref<9xf32, #tpu.memory_space<smem>>
    %c3 = arith.constant 3 : index
    %3 = memref.load %arg1[%c3] : memref<9xf32, #tpu.memory_space<smem>>
    %c4 = arith.constant 4 : index
    %4 = memref.load %arg1[%c4] : memref<9xf32, #tpu.memory_space<smem>>
    %c5 = arith.constant 5 : index
    %5 = memref.load %arg1[%c5] : memref<9xf32, #tpu.memory_space<smem>>
    %c6 = arith.constant 6 : index
    %6 = memref.load %arg1[%c6] : memref<9xf32, #tpu.memory_space<smem>>
    %c7 = arith.constant 7 : index
    %7 = memref.load %arg1[%c7] : memref<9xf32, #tpu.memory_space<smem>>
    %c8 = arith.constant 8 : index
    %8 = memref.load %arg1[%c8] : memref<9xf32, #tpu.memory_space<smem>>
    %c0_0 = arith.constant 0 : index
    %9 = memref.load %arg2[%c0_0] : memref<1xf32, #tpu.memory_space<smem>>
    %c0_1 = arith.constant 0 : index
    %c0_2 = arith.constant 0 : index
    %c0_3 = arith.constant 0 : index
    %10 = vector.load %arg3[%c0_1, %c0_2, %c0_3] : memref<2x24x128xf32, #tpu.memory_space<vmem>>, vector<1x16x128xf32>
    %11 = vector.shape_cast %10 : vector<1x16x128xf32> to vector<16x128xf32>
    %12 = vector.broadcast %0 : f32 to vector<16x128xf32>
    %13 = arith.mulf %11, %12 : vector<16x128xf32>
    %14 = vector.broadcast %9 : f32 to vector<16x128xf32>
    %15 = arith.addf %13, %14 : vector<16x128xf32>
    %c127_i32 = arith.constant 127 : i32
    %16 = tpu.dynamic_rotate %11 by %c127_i32 dim 1 : vector<16x128xf32>, i32 -> vector<16x128xf32>
    %17 = vector.broadcast %1 : f32 to vector<16x128xf32>
    %18 = arith.mulf %16, %17 : vector<16x128xf32>
    %19 = arith.addf %15, %18 : vector<16x128xf32>
    %c126_i32 = arith.constant 126 : i32
    %20 = tpu.dynamic_rotate %11 by %c126_i32 dim 1 : vector<16x128xf32>, i32 -> vector<16x128xf32>
    %21 = vector.broadcast %2 : f32 to vector<16x128xf32>
    %22 = arith.mulf %20, %21 : vector<16x128xf32>
    %23 = arith.addf %19, %22 : vector<16x128xf32>
    %c0_4 = arith.constant 0 : index
    %c1_5 = arith.constant 1 : index
    %c0_6 = arith.constant 0 : index
    %24 = vector.load %arg3[%c0_4, %c1_5, %c0_6] : memref<2x24x128xf32, #tpu.memory_space<vmem>>, vector<1x16x128xf32>
    %25 = vector.shape_cast %24 : vector<1x16x128xf32> to vector<16x128xf32>
    %26 = vector.broadcast %3 : f32 to vector<16x128xf32>
    %27 = arith.mulf %25, %26 : vector<16x128xf32>
    %28 = arith.addf %23, %27 : vector<16x128xf32>
    %c127_i32_7 = arith.constant 127 : i32
    %29 = tpu.dynamic_rotate %25 by %c127_i32_7 dim 1 : vector<16x128xf32>, i32 -> vector<16x128xf32>
    %30 = vector.broadcast %4 : f32 to vector<16x128xf32>
    %31 = arith.mulf %29, %30 : vector<16x128xf32>
    %32 = arith.addf %28, %31 : vector<16x128xf32>
    %c126_i32_8 = arith.constant 126 : i32
    %33 = tpu.dynamic_rotate %25 by %c126_i32_8 dim 1 : vector<16x128xf32>, i32 -> vector<16x128xf32>
    %34 = vector.broadcast %5 : f32 to vector<16x128xf32>
    %35 = arith.mulf %33, %34 : vector<16x128xf32>
    %36 = arith.addf %32, %35 : vector<16x128xf32>
    %c0_9 = arith.constant 0 : index
    %c2_10 = arith.constant 2 : index
    %c0_11 = arith.constant 0 : index
    %37 = vector.load %arg3[%c0_9, %c2_10, %c0_11] : memref<2x24x128xf32, #tpu.memory_space<vmem>>, vector<1x16x128xf32>
    %38 = vector.shape_cast %37 : vector<1x16x128xf32> to vector<16x128xf32>
    %39 = vector.broadcast %6 : f32 to vector<16x128xf32>
    %40 = arith.mulf %38, %39 : vector<16x128xf32>
    %41 = arith.addf %36, %40 : vector<16x128xf32>
    %c127_i32_12 = arith.constant 127 : i32
    %42 = tpu.dynamic_rotate %38 by %c127_i32_12 dim 1 : vector<16x128xf32>, i32 -> vector<16x128xf32>
    %43 = vector.broadcast %7 : f32 to vector<16x128xf32>
    %44 = arith.mulf %42, %43 : vector<16x128xf32>
    %45 = arith.addf %41, %44 : vector<16x128xf32>
    %c126_i32_13 = arith.constant 126 : i32
    %46 = tpu.dynamic_rotate %38 by %c126_i32_13 dim 1 : vector<16x128xf32>, i32 -> vector<16x128xf32>
    %47 = vector.broadcast %8 : f32 to vector<16x128xf32>
    %48 = arith.mulf %46, %47 : vector<16x128xf32>
    %49 = arith.addf %45, %48 : vector<16x128xf32>
    %c0_14 = arith.constant 0 : index
    %c0_15 = arith.constant 0 : index
    %c0_16 = arith.constant 0 : index
    %50 = vector.load %arg4[%c0_14, %c0_15, %c0_16] : memref<2x16x128xf32, #tpu.memory_space<vmem>>, vector<1x16x128xf32>
    %51 = vector.shape_cast %50 : vector<1x16x128xf32> to vector<16x128xf32>
    %52 = vector.shape_cast %49 : vector<16x128xf32> to vector<1x16x128xf32>
    tpu.vector_store %arg4[%c0_14, %c0_15, %c0_16], %52 {strides = array<i32>} : memref<2x16x128xf32, #tpu.memory_space<vmem>>, vector<1x16x128xf32>,
    %c1_17 = arith.constant 1 : index
    %c0_18 = arith.constant 0 : index
    %c0_19 = arith.constant 0 : index
    %53 = vector.load %arg3[%c1_17, %c0_18, %c0_19] : memref<2x24x128xf32, #tpu.memory_space<vmem>>, vector<1x16x128xf32>
    %54 = vector.shape_cast %53 : vector<1x16x128xf32> to vector<16x128xf32>
    %55 = vector.broadcast %0 : f32 to vector<16x128xf32>
    %56 = arith.mulf %54, %55 : vector<16x128xf32>
    %57 = vector.broadcast %9 : f32 to vector<16x128xf32>
    %58 = arith.addf %56, %57 : vector<16x128xf32>
    %c127_i32_20 = arith.constant 127 : i32
    %59 = tpu.dynamic_rotate %54 by %c127_i32_20 dim 1 : vector<16x128xf32>, i32 -> vector<16x128xf32>
    %60 = vector.broadcast %1 : f32 to vector<16x128xf32>
    %61 = arith.mulf %59, %60 : vector<16x128xf32>
    %62 = arith.addf %58, %61 : vector<16x128xf32>
    %c126_i32_21 = arith.constant 126 : i32
    %63 = tpu.dynamic_rotate %54 by %c126_i32_21 dim 1 : vector<16x128xf32>, i32 -> vector<16x128xf32>
    %64 = vector.broadcast %2 : f32 to vector<16x128xf32>
    %65 = arith.mulf %63, %64 : vector<16x128xf32>
    %66 = arith.addf %62, %65 : vector<16x128xf32>
    %c1_22 = arith.constant 1 : index
    %c1_23 = arith.constant 1 : index
    %c0_24 = arith.constant 0 : index
    %67 = vector.load %arg3[%c1_22, %c1_23, %c0_24] : memref<2x24x128xf32, #tpu.memory_space<vmem>>, vector<1x16x128xf32>
    %68 = vector.shape_cast %67 : vector<1x16x128xf32> to vector<16x128xf32>
    %69 = vector.broadcast %3 : f32 to vector<16x128xf32>
    %70 = arith.mulf %68, %69 : vector<16x128xf32>
    %71 = arith.addf %66, %70 : vector<16x128xf32>
    %c127_i32_25 = arith.constant 127 : i32
    %72 = tpu.dynamic_rotate %68 by %c127_i32_25 dim 1 : vector<16x128xf32>, i32 -> vector<16x128xf32>
    %73 = vector.broadcast %4 : f32 to vector<16x128xf32>
    %74 = arith.mulf %72, %73 : vector<16x128xf32>
    %75 = arith.addf %71, %74 : vector<16x128xf32>
    %c126_i32_26 = arith.constant 126 : i32
    %76 = tpu.dynamic_rotate %68 by %c126_i32_26 dim 1 : vector<16x128xf32>, i32 -> vector<16x128xf32>
    %77 = vector.broadcast %5 : f32 to vector<16x128xf32>
    %78 = arith.mulf %76, %77 : vector<16x128xf32>
    %79 = arith.addf %75, %78 : vector<16x128xf32>
    %c1_27 = arith.constant 1 : index
    %c2_28 = arith.constant 2 : index
    %c0_29 = arith.constant 0 : index
    %80 = vector.load %arg3[%c1_27, %c2_28, %c0_29] : memref<2x24x128xf32, #tpu.memory_space<vmem>>, vector<1x16x128xf32>
    %81 = vector.shape_cast %80 : vector<1x16x128xf32> to vector<16x128xf32>
    %82 = vector.broadcast %6 : f32 to vector<16x128xf32>
    %83 = arith.mulf %81, %82 : vector<16x128xf32>
    %84 = arith.addf %79, %83 : vector<16x128xf32>
    %c127_i32_30 = arith.constant 127 : i32
    %85 = tpu.dynamic_rotate %81 by %c127_i32_30 dim 1 : vector<16x128xf32>, i32 -> vector<16x128xf32>
    %86 = vector.broadcast %7 : f32 to vector<16x128xf32>
    %87 = arith.mulf %85, %86 : vector<16x128xf32>
    %88 = arith.addf %84, %87 : vector<16x128xf32>
    %c126_i32_31 = arith.constant 126 : i32
    %89 = tpu.dynamic_rotate %81 by %c126_i32_31 dim 1 : vector<16x128xf32>, i32 -> vector<16x128xf32>
    %90 = vector.broadcast %8 : f32 to vector<16x128xf32>
    %91 = arith.mulf %89, %90 : vector<16x128xf32>
    %92 = arith.addf %88, %91 : vector<16x128xf32>
    %c1_32 = arith.constant 1 : index
    %c0_33 = arith.constant 0 : index
    %c0_34 = arith.constant 0 : index
    %93 = vector.load %arg4[%c1_32, %c0_33, %c0_34] : memref<2x16x128xf32, #tpu.memory_space<vmem>>, vector<1x16x128xf32>
    %94 = vector.shape_cast %93 : vector<1x16x128xf32> to vector<16x128xf32>
    %95 = vector.shape_cast %92 : vector<16x128xf32> to vector<1x16x128xf32>
    tpu.vector_store %arg4[%c1_32, %c0_33, %c0_34], %95 {strides = array<i32>} : memref<2x16x128xf32, #tpu.memory_space<vmem>>, vector<1x16x128xf32>,
    return
  }
  func.func @transform_0(%arg0: i32) -> i32 {
    %c0_i32 = arith.constant 0 : i32
    %c0_i32_0 = arith.constant 0 : i32
    return %c0_i32 : i32
  }
  func.func @transform_1(%arg0: i32) -> i32 {
    %c0_i32 = arith.constant 0 : i32
    %c0_i32_0 = arith.constant 0 : i32
    return %c0_i32 : i32
  }
  func.func @transform_2(%arg0: i32) -> (i32, i32, i32) {
    %c0_i32 = arith.constant 0 : i32
    %c0_i32_0 = arith.constant 0 : i32
    %c0_i32_1 = arith.constant 0 : i32
    return %arg0, %c0_i32, %c0_i32_0 : i32, i32, i32
  }
  func.func @transform_3(%arg0: i32) -> (i32, i32, i32) {
    %c0_i32 = arith.constant 0 : i32
    %c0_i32_0 = arith.constant 0 : i32
    %c0_i32_1 = arith.constant 0 : i32
    return %arg0, %c0_i32, %c0_i32_0 : i32, i32, i32
  }
}

</mosaic_0001>

<bundles_post_ra>
// kernel: tpu_custom_call.1
= control target key start
LH: loop header
LB: loop body
LE: loop exit
PB: predicated region body
PF: predicated region fallthrough
CT: control target
= control target key end

     0   :  { %s950_s0 = inlined_call_operand.vmem [shape: f32[9], index: 0, kind: input, shape index: {}]   ;;  %s951_s1 = inlined_call_operand.<no memory space> [shape: f32[1], index: 1, kind: input, shape index: {}]   ;;  %s952_s2 = inlined_call_operand.hbm [shape: f32[4,24,128], index: 2, kind: input, shape index: {}]   ;;  %s953_s3 = inlined_call_operand.hbm [shape: f32[4,16,128], index: 3, kind: output, shape index: {}]  }
   0x1   :  { %8 = sst [smem:[#allocation2]] %s951_s1 }
   0x2   :  { %9 = vsyncpa [#allocation6], 0 }
   0x3   :  { %10 = vsyncpa [#allocation4], 0 }
   0x4   :  { %12 = vsyncpa [#allocation4 + $0x1], 0 }
   0x5   :  { %13 = vsyncpa [#allocation5], 0 }
   0x6   :  { %15 = vsyncpa [#allocation5 + $0x1], 0  ;;  %s714_s14 = smov 0   ;;  %s716_s15 = smov 0  }
   0x7   :  { %s718_s16 = smov 0   ;;  %s720_s17 = smov 0  }
   0x8 LB: > { %s735_s1 = sadd.s32 4294967295, %s680_s17   ;;  %s465_s18 = sadd.s32 4294967294, %s680_s17   ;;  %s680_s17 = sphi %s720_s17, %s973_s17   ;;  %s676_s16 = sphi %s718_s16, %s972_s16   ;;  %s672_s15 = sphi %s716_s15, %s971_s15   ;;  %s668_s14 = sphi %s714_s14, %s970_s14  }
   0x9   : > { %s739_s19 = sadd.s32 1, %s680_s17   ;;  %s70_s20 = sadd.s32 1, %s676_s16 }
   0xa   : > { %s67_s21 = ssub.s32 %s680_s17, %s739_s19  ;;  %p77_p0 = scmp.ne.s32.totalorder %s676_s16, %s672_s15 }
   0xb   : > { %p68_p1 = scmp.eq.s32.totalorder %s67_s21, 0  ;;  %p78_p2 = scmp.eq.s32.totalorder %s680_s17, 0 }
   0xc   : > { %p83_p3 = scmp.ne.s32.totalorder %s672_s15, %s668_s14  ;;  %p955_p4 = scmp.eq.s32.totalorder %s735_s1, 0 }
   0xd   : > { %s751_s22 = scalar_select %p68_p1, %s676_s16, %s70_s20  }
   0xe   : > { %p753_p5 = por %p78_p2, %p77_p0  ;;  %p759_p6 = por %p955_p4, %p83_p3 }
   0xf   : > { %p107_p7 = scmp.eq.s32.totalorder %s735_s1, 1  ;;  %p113_p8 = scmp.eq.s32.totalorder %s465_s18, 1 }
  0x10   : > { %s958_s24 = scalar_select %p759_p6, 1, 0 }
  0x11   : > { %p466_p9 = scmp.ge.s32.totalorder %s680_s17, 1  ;;  %p120_p10 = scmp.lt.s32.totalorder %s680_s17, 3 }
  0x12   : > { %p766_p11 = por %p107_p7, %p77_p0  ;;  %p770_p12 = por %p113_p8, %p83_p3 }
  0x13   : > { %p774_p13 = pnand %p466_p9, %p120_p10  ;;  %s133_s30 = sshll.u32 %s950_s0, 4  ;;  %s134_s30 = int_to_ptr.vmem [resolvable:$true] %s133_s30 }
  0x14   : > { %s959_s25 = scalar_select %p766_p11, 1, 0 }
  0x15   : > { %s960_s26 = scalar_select %p770_p12, 1, 0 }
  0x16   : > { %p510_p1 = pneg %p774_p13  ;;  %p523_p2 = scmp.lt.s32.totalorder %s680_s17, 2 }
  0x17   : > { %s147_s5 = sand.u32 1, %s676_s16   ;;  %s565_s8 = scalar_lea.vmem %s134_s30, 16 }
  0x18   : > { %p787_p7 = pnand %p510_p1, %p955_p4  ;;  %p794_p3 = pnand %p523_p2, %p753_p5 }
  0x19   : > { %s499_s7 = smul.u32 48, %s147_s5  ;;  %p566_p8 = scmp.ne.s32.totalorder %s134_s30, %s565_s8 }
  0x1a   : > { %p567_p9 = pneg %p787_p7  ;;  %p573_p12 = scmp.lt.s32.totalorder %s134_s30, %s134_s30 }
  0x1b   : > { %p574_p11 = scmp.lt.s32.totalorder %s565_s8, %s565_s8 }
  0x1c   : > { %p568_p10 = pnand %p567_p9, %p566_p8 }
  0x1d   : > { %p575_p1 = por %p574_p11, %p573_p12 }
  0x1e   : > { %p569_p0 = pneg %p568_p10 }
  0x20   : > { %p576_p4 = pnand %p575_p1, %p569_p0 }
  0x22   : > { %579 = shalt.err (!%p576_p4)
}
  0x23   : > { %s682_s9 = smov [#allocation3]   ;;  %s500_s10 = smul.u32 768, %s680_s17 }
  0x24   : > { %513 = dma.vmem_to_smem (!%p787_p7), %s134_s30, 16, %s682_s9, [#allocation6]  }
  0x25   : > { %s151_s11 = scalar_lea.vmem [#allocation7], %s499_s7  ;;  %s808_s20 = scalar_lea.hbm %s952_s2, %s500_s10 }
  0x26   : > { %s159_s12 = sshll.u32 %s151_s11, 4  ;;  %s810_s21 = scalar_lea.sflag [#allocation4], %s147_s5  ;;  %s803_s12 = int_to_ptr.vmem [resolvable:$true] %s159_s12 }
  0x27   : > { %s580_s23 = scalar_lea.hbm %s808_s20, 768  ;;  %p582_p5 = pneg %p794_p3 }
  0x28   : > { %p581_p4 = scmp.ne.s32.totalorder %s808_s20, %s580_s23  ;;  %s585_s30 = scalar_lea.hbm %s952_s2, 1536 }
  0x29   : > { %p586_p0 = scmp.lt.u32.totalorder %s808_s20, %s952_s2  ;;  %p587_p2 = scmp.lt.u32.totalorder %s585_s30, %s580_s23 }
  0x2a   : > { %p583_p11 = pnand %p582_p5, %p581_p4  ;;  %p589_p8 = scmp.lt.u32.totalorder %s580_s23, %s808_s20 }
  0x2b   : > { %p588_p7 = por %p587_p2, %p586_p0 }
  0x2c   : > { %p584_p12 = pneg %p583_p11 }
  0x2d   : > { %p590_p9 = por %p589_p8, %p588_p7 }
  0x2f   : > { %p591_p10 = pnand %p590_p9, %p584_p12 }
  0x31   : > { %594 = shalt.err (!%p591_p10)
}
  0x32   : > { %s595_s5 = scalar_lea.vmem %s803_s12, 768  ;;  %s683_s8 = smov [#allocation7]  }
  0x33   : > { %p596_p1 = scmp.ne.s32.totalorder %s803_s12, %s595_s5  ;;  %s600_s9 = sshll.u32 %s683_s8, 4  ;;  %s601_s9 = int_to_ptr.vmem [resolvable:$false] %s600_s9 }
  0x34   : > { %s602_s10 = scalar_lea.vmem %s601_s9, 1536  ;;  %p603_p6 = scmp.lt.s32.totalorder %s803_s12, %s601_s9 }
  0x35   : > { %p598_p4 = pnand %p596_p1, %p582_p5  ;;  %p604_p0 = scmp.lt.s32.totalorder %s602_s10, %s595_s5 }
  0x37   : > { %p599_p11 = pneg %p598_p4  ;;  %p605_p2 = por %p604_p0, %p603_p6 }
  0x39   : > { %p606_p7 = pnand %p605_p2, %p599_p11 }
  0x3b   : > { %609 = shalt.err (!%p606_p7)
}
  0x3c   : > { %s684_s11 = smov 128   ;;  %s685_s13 = smov 8  }
  0x3d   : > { %517 = dma.hbm_to_vmem [thread:$0]  (!%p794_p3), %s808_s20, 768, %s803_s12, %s810_s21, %s684_s11, %s684_s11, %s685_s13  }
  0x3e   : > { %171 = sbr.rel (%p774_p13) target bundleno = 256 (0x100), region = 32  ;;  %p964_p5 = scmp.eq.s32.totalorder (!%p774_p13), %s735_s1, 0 }
  0x45   : > { %655 = dma.done.wait (%p964_p5), [#allocation6], 16   ;;  %p965_p12 = pmov %p964_p5 }
  0x46   : > { %s845_s18 = sand.u32 1, %s672_s15   ;;  %p966_p6 = scmp.ne.s32.totalorder %s958_s24, 0 }
  0x47   : > { %657 = vsyncadd (%p965_p12), [#allocation6], 4294967280  ;;  %s501_s23 = smul.u32 48, %s845_s18  ;;  %s178_s28 = scalar_lea.sflag [#allocation4], %s845_s18 }
  0x49   : > { %s849_s29 = scalar_lea.vmem [#allocation7], %s501_s23 }
  0x4a   : > { %659 = dma.done.wait (%p966_p6), %s178_s28, 768  }
  0x4b   : > { %661 = vsyncadd (%p966_p6), %s178_s28, 4294966528 }
  0x4c   : > { %186 = sfence }
  0x4d   : > { %v483_v0 = vld [vmem:[%s849_s29 + $0x18] sm:$0xff]  ;;  %v217_v1 = vld [vmem:[%s849_s29] sm:$0xff]  ;;  %s686_s27 = smov 127   ;;  %v218_v3 = vld [vmem:[%s849_s29 + $0x8] sm:$0xff]  ;;  %s687_s24 = smov 126  }
  0x4e   : > { %302 = vrot.lane.b32.xlu1 %v483_v0, %s686_s27  ;;  %225 = vrot.lane.b32.xlu0 %v217_v1, %s686_s27  ;;  %v484_v2 = vld [vmem:[%s849_s29 + $0x20] sm:$0xff]  ;;  %v244_v4 = vld [vmem:[%s849_s29 + $0x9] sm:$0xff]  ;;  %s207_s6 = sld [smem:[#allocation3]]  ;;  %s475_s12 = sld [smem:[#allocation3 + $0x1]] }
  0x4f   : > { %v243_v5 = vld [vmem:[%s849_s29 + $0x1] sm:$0xff]  ;;  %v485_v7 = vld [vmem:[%s849_s29 + $0x19] sm:$0xff]  ;;  %v872_v8 = vld [vmem:[%s849_s29 + $0xa] sm:$0xff]  ;;  %s216_s20 = sld [smem:[#allocation2]]  ;;  %s477_s21 = sld [smem:[#allocation3 + $0x3]] }
  0x50   : > { %v486_v6 = vld [vmem:[%s849_s29 + $0x21] sm:$0xff]  ;;  %s476_s30 = sld [smem:[#allocation3 + $0x2]]  ;;  %s478_s4 = sld [smem:[#allocation3 + $0x4]] }
  0x51   : > { %v875_v9 = vld [vmem:[%s849_s29 + $0x2] sm:$0xff]  ;;  %v885_v11 = vld [vmem:[%s849_s29 + $0x1a] sm:$0xff]  ;;  %s480_s7 = sld [smem:[#allocation3 + $0x6]]  ;;  %s479_s5 = sld [smem:[#allocation3 + $0x5]] }
  0x52   : > { %304 = vrot.lane.b32.xlu1 %v484_v2, %s686_s27  ;;  %227 = vrot.lane.b32.xlu0 %v218_v3, %s686_s27  ;;  %v882_v10 = vld [vmem:[%s849_s29 + $0x22] sm:$0xff]  ;;  %s481_s8 = sld [smem:[#allocation3 + $0x7]]  ;;  %s482_s9 = sld [smem:[#allocation3 + $0x8]] }
  0x53   : > { %s474_s10 = sshll.u32 %s845_s18, 5  ;;  %s498_s23 = sshll.u32 %s735_s1, 9 }
  0x54   : > { %v219_v12 = vstv %s207_s6  ;;  %v229_v18 = vstv %s475_s12  ;;  %s204_s11 = scalar_lea.vmem [#allocation8], %s474_s10  ;;  %s366_s1 = scalar_lea.sflag [#allocation5], %s845_s18 }
  0x55   : > { %v220_v15 = vmul.f32 %v219_v12, %v217_v1  ;;  %v221_v16 = vmul.f32 %v219_v12, %v218_v3  ;;  %v222_v17 = vstv %s216_s20  ;;  %v298_v19 = vmul.f32 %v483_v0, %v219_v12  ;;  %s380_s13 = sshll.u32 %s204_s11, 4  ;;  %p967_p3 = scmp.ne.s32.totalorder %s959_s25, 0  ;;  %s901_s13 = int_to_ptr.vmem [resolvable:$true] %s380_s13 }
  0x56   : > { %236 = vrot.lane.b32.xlu1 %v218_v3, %s687_s24  ;;  %234 = vrot.lane.b32.xlu0 %v217_v1, %s687_s24  ;;  %v299_v20 = vmul.f32 %v484_v2, %v219_v12  ;;  %v245_v21 = vstv %s477_s21  ;;  %v238_v28 = vstv %s476_s30  ;;  %s688_s6 = smov [#allocation8]  }
  0x57   : > { %v223_v24 = vadd.f32 %v222_v17, %v220_v15  ;;  %v224_v26 = vadd.f32 %v222_v17, %v221_v16  ;;  %v247_v29 = vmul.f32 %v245_v21, %v244_v4  ;;  %v246_v30 = vmul.f32 %v245_v21, %v243_v5  ;;  %s614_s12 = sshll.u32 %s688_s6, 4  ;;  %s615_s12 = int_to_ptr.vmem [resolvable:$false] %s614_s12 }
  0x58   : > { %v300_v31 = vadd.f32 %v298_v19, %v222_v17  ;;  %v301_v33 = vadd.f32 %v299_v20, %v222_v17  ;;  %v321_v43 = vmul.f32 %v486_v6, %v245_v21  ;;  %v320_v44 = vmul.f32 %v485_v7, %v245_v21  ;;  %s616_s20 = scalar_lea.vmem %s615_s12, 1024  ;;  %p617_p10 = scmp.lt.s32.totalorder %s901_s13, %s615_s12 }
  0x59   : > { %v254_v59 = vstv %s478_s4  ;;  %v270_v62 = vstv %s480_s7  ;;  %v263_v1 = vstv %s479_s5 }
  0x5a   : > { %312 = vrot.lane.b32.xlu1 %v484_v2, %s687_s24  ;;  %310 = vrot.lane.b32.xlu0 %v483_v0, %s687_s24  ;;  %v272_v2 = vmul.f32 %v270_v62, %v872_v8  ;;  %v271_v3 = vmul.f32 %v270_v62, %v875_v9  ;;  %v342_v19 = vmul.f32 %v885_v11, %v270_v62 }
  0x5e   : > { %252 = vrot.lane.b32.xlu1 %v244_v4, %s686_s27  ;;  %250 = vrot.lane.b32.xlu0 %v243_v5, %s686_s27 }
  0x62   : > { %326 = vrot.lane.b32.xlu1 %v486_v6, %s686_s27  ;;  %324 = vrot.lane.b32.xlu0 %v485_v7, %s686_s27 }
  0x66   : > { %261 = vrot.lane.b32.xlu1 %v244_v4, %s687_s24  ;;  %259 = vrot.lane.b32.xlu0 %v243_v5, %s687_s24 }
  0x6a   : > { %334 = vrot.lane.b32.xlu1 %v486_v6, %s687_s24  ;;  %332 = vrot.lane.b32.xlu0 %v485_v7, %s687_s24 }
  0x6e   : > { %277 = vrot.lane.b32.xlu1 %v872_v8, %s686_s27  ;;  %275 = vrot.lane.b32.xlu0 %v875_v9, %s686_s27 }
  0x72   : > { %348 = vrot.lane.b32.xlu1 %v882_v10, %s686_s27  ;;  %346 = vrot.lane.b32.xlu0 %v885_v11, %s686_s27  ;;  %s906_s27 = scalar_lea.hbm %s953_s3, %s498_s23 }
  0x76   : > { %286 = vrot.lane.b32.xlu1 %v872_v8, %s687_s24  ;;  %284 = vrot.lane.b32.xlu0 %v875_v9, %s687_s24 }
  0x7a   : > { %356 = vrot.lane.b32.xlu1 %v882_v10, %s687_s24  ;;  %354 = vrot.lane.b32.xlu0 %v885_v11, %s687_s24  ;;  %s610_s24 = scalar_lea.vmem %s901_s13, 512 }
  0x7b   : > { %p611_p13 = scmp.ne.s32.totalorder %s901_s13, %s610_s24  ;;  %p618_p1 = scmp.lt.s32.totalorder %s616_s20, %s610_s24 }
  0x7d   : > { %p612_p8 = pnand %p611_p13, %p967_p3  ;;  %p619_p4 = por %p618_p1, %p617_p10 }
  0x7f   : > { %p613_p9 = pneg %p612_p8 }
  0x81   : > { %p620_p11 = pnand %p619_p4, %p613_p9 }
  0xc0   : > { %v303_v13 = vpop.permute.xlu1 %302  ;;  %v226_v14 = vpop.permute.xlu0 %225 }
  0xc1   : > { %v230_v25 = vmul.f32 %v229_v18, %v226_v14  ;;  %v306_v32 = vmul.f32 %v303_v13, %v229_v18 }
  0xc3   : > { %v232_v37 = vadd.f32 %v230_v25, %v223_v24  ;;  %v308_v45 = vadd.f32 %v306_v32, %v300_v31 }
  0xc4   : > { %v305_v22 = vpop.permute.xlu1 %304  ;;  %v228_v23 = vpop.permute.xlu0 %227 }
  0xc5   : > { %v231_v27 = vmul.f32 %v229_v18, %v228_v23  ;;  %v307_v34 = vmul.f32 %v305_v22, %v229_v18  ;;  %v343_v18 = vmul.f32 %v882_v10, %v270_v62 }
  0xc7   : > { %v233_v38 = vadd.f32 %v231_v27, %v224_v26  ;;  %v309_v46 = vadd.f32 %v307_v34, %v301_v33 }
  0xc8   : > { %v237_v35 = vpop.permute.xlu1 %236  ;;  %v235_v36 = vpop.permute.xlu0 %234 }
  0xc9   : > { %v240_v39 = vmul.f32 %v238_v28, %v237_v35  ;;  %v239_v40 = vmul.f32 %v238_v28, %v235_v36  ;;  %v288_v35 = vstv %s482_s9 }
  0xcb   : > { %v242_v41 = vadd.f32 %v240_v39, %v233_v38  ;;  %v241_v42 = vadd.f32 %v239_v40, %v232_v37 }
  0xcc   : > { %v313_v47 = vpop.permute.xlu1 %312  ;;  %v311_v48 = vpop.permute.xlu0 %310 }
  0xcd   : > { %v315_v49 = vmul.f32 %v313_v47, %v238_v28  ;;  %v314_v50 = vmul.f32 %v311_v48, %v238_v28  ;;  %v249_v51 = vadd.f32 %v247_v29, %v242_v41  ;;  %v248_v52 = vadd.f32 %v246_v30, %v241_v42 }
  0xce   : > { %v279_v30 = vstv %s481_s8 }
  0xcf   : > { %v317_v53 = vadd.f32 %v315_v49, %v309_v46  ;;  %v316_v54 = vadd.f32 %v314_v50, %v308_v45 }
  0xd0   : > { %v253_v55 = vpop.permute.xlu1 %252  ;;  %v251_v56 = vpop.permute.xlu0 %250 }
  0xd1   : > { %v323_v57 = vadd.f32 %v321_v43, %v317_v53  ;;  %v322_v58 = vadd.f32 %v320_v44, %v316_v54  ;;  %v256_v63 = vmul.f32 %v254_v59, %v253_v55  ;;  %v255_v0 = vmul.f32 %v254_v59, %v251_v56 }
  0xd3   : > { %v258_v12 = vadd.f32 %v256_v63, %v249_v51  ;;  %v257_v13 = vadd.f32 %v255_v0, %v248_v52 }
  0xd4   : > { %v327_v60 = vpop.permute.xlu1 %326  ;;  %v325_v61 = vpop.permute.xlu0 %324 }
  0xd5   : > { %v329_v4 = vmul.f32 %v327_v60, %v254_v59  ;;  %v328_v5 = vmul.f32 %v325_v61, %v254_v59 }
  0xd7   : > { %v331_v20 = vadd.f32 %v329_v4, %v323_v57  ;;  %v330_v21 = vadd.f32 %v328_v5, %v322_v58 }
  0xd8   : > { %v262_v6 = vpop.permute.xlu1 %261  ;;  %v260_v7 = vpop.permute.xlu0 %259 }
  0xd9   : > { %v265_v14 = vmul.f32 %v263_v1, %v262_v6  ;;  %v264_v15 = vmul.f32 %v263_v1, %v260_v7 }
  0xdb   : > { %v267_v16 = vadd.f32 %v265_v14, %v258_v12  ;;  %v266_v17 = vadd.f32 %v264_v15, %v257_v13 }
  0xdc   : > { %v335_v8 = vpop.permute.xlu1 %334  ;;  %v333_v22 = vpop.permute.xlu0 %332 }
  0xdd   : > { %v337_v9 = vmul.f32 %v335_v8, %v263_v1  ;;  %v336_v23 = vmul.f32 %v333_v22, %v263_v1  ;;  %v274_v24 = vadd.f32 %v272_v2, %v267_v16  ;;  %v273_v25 = vadd.f32 %v271_v3, %v266_v17 }
  0xdf   : > { %v339_v26 = vadd.f32 %v337_v9, %v331_v20  ;;  %v338_v27 = vadd.f32 %v336_v23, %v330_v21 }
  0xe0   : > { %v278_v28 = vpop.permute.xlu1 %277  ;;  %v276_v29 = vpop.permute.xlu0 %275 }
  0xe1   : > { %v345_v31 = vadd.f32 %v343_v18, %v339_v26  ;;  %v344_v32 = vadd.f32 %v342_v19, %v338_v27  ;;  %v281_v10 = vmul.f32 %v279_v30, %v278_v28  ;;  %v280_v33 = vmul.f32 %v279_v30, %v276_v29 }
  0xe3   : > { %v283_v36 = vadd.f32 %v281_v10, %v274_v24  ;;  %v282_v37 = vadd.f32 %v280_v33, %v273_v25 }
  0xe4   : > { %v349_v11 = vpop.permute.xlu1 %348  ;;  %v347_v34 = vpop.permute.xlu0 %346 }
  0xe5   : > { %v351_v40 = vmul.f32 %v349_v11, %v279_v30  ;;  %v350_v41 = vmul.f32 %v347_v34, %v279_v30 }
  0xe7   : > { %v353_v48 = vadd.f32 %v351_v40, %v345_v31  ;;  %v352_v49 = vadd.f32 %v350_v41, %v344_v32 }
  0xe8   : > { %v287_v38 = vpop.permute.xlu1 %286  ;;  %v285_v39 = vpop.permute.xlu0 %284 }
  0xe9   : > { %v290_v42 = vmul.f32 %v288_v35, %v287_v38  ;;  %v289_v43 = vmul.f32 %v288_v35, %v285_v39 }
  0xeb   : > { %v292_v44 = vadd.f32 %v290_v42, %v283_v36  ;;  %v291_v45 = vadd.f32 %v289_v43, %v282_v37 }
  0xec   : > { %v357_v46 = vpop.permute.xlu1 %356  ;;  %v355_v47 = vpop.permute.xlu0 %354 }
  0xed   : > { %294 = vst [vmem:[%s204_s11 + $0x8] sm:$0xff] %v292_v44  ;;  %293 = vst [vmem:[%s204_s11] sm:$0xff] %v291_v45  ;;  %v359_v50 = vmul.f32 %v357_v46, %v288_v35  ;;  %v358_v51 = vmul.f32 %v355_v47, %v288_v35 }
  0xef   : > { %v361_v52 = vadd.f32 %v359_v50, %v353_v48  ;;  %v360_v53 = vadd.f32 %v358_v51, %v352_v49 }
  0xf1   : > { %490 = vst [vmem:[%s204_s11 + $0x18] sm:$0xff] %v361_v52  ;;  %489 = vst [vmem:[%s204_s11 + $0x10] sm:$0xff] %v360_v53 }
  0xf2   : > { %623 = shalt.err (!%p620_p11)
}
  0xf3   : > { %s624_s21 = scalar_lea.hbm %s906_s27, 512  ;;  %s628_s7 = scalar_lea.hbm %s953_s3, 1024 }
  0xf4   : > { %p625_p0 = scmp.ne.s32.totalorder %s906_s27, %s624_s21  ;;  %p629_p5 = scmp.lt.u32.totalorder %s906_s27, %s953_s3 }
  0xf5   : > { %p630_p12 = scmp.lt.u32.totalorder %s628_s7, %s624_s21  ;;  %p632_p13 = scmp.lt.u32.totalorder %s624_s21, %s906_s27 }
  0xf6   : > { %p626_p2 = pnand %p625_p0, %p967_p3 }
  0xf7   : > { %p631_p6 = por %p630_p12, %p629_p5 }
  0xf8   : > { %p627_p7 = pneg %p626_p2 }
  0xf9   : > { %p633_p8 = por %p632_p13, %p631_p6 }
  0xfb   : > { %p634_p9 = pnand %p633_p8, %p627_p7 }
  0xfd   : > { %637 = shalt.err (!%p634_p9)
}
  0xfe   : > { %s689_s9 = smov 128   ;;  %s690_s10 = smov 8  }
  0xff   : > { %508 = dma.vmem_to_hbm [thread:$0]  (%p967_p3), %s901_s13, 512, %s906_s27, %s366_s1, %s689_s9, %s689_s9, %s690_s10  }
 0x100 PF: > { %s395_s11 = sand.u32 1, %s668_s14   ;;  %p968_p10 = scmp.ne.s32.totalorder %s960_s26, 0 }
 0x101   : > { %p969_p1 = scmp.ge.s32.totalorder %s680_s17, 2  ;;  %s396_s23 = scalar_lea.sflag [#allocation5], %s395_s11 }
 0x103   : > { %p519_p4 = pnand %p969_p1, %p968_p10 }
 0x105   : > { %663 = dma.done.wait (!%p519_p4), %s396_s23, 512  }
 0x106   : > { %665 = vsyncadd (!%p519_p4), %s396_s23, 4294966784  ;;  %p18_p11 = scmp.ge.s32.totalorder %s739_s19, 4   ;;  %s970_s14 = smov %s672_s15 }
 0x107   : > { %s971_s15 = smov %s676_s16  ;;  %s972_s16 = smov %s751_s22 }
 0x108   : > { %s973_s17 = smov %s739_s19  ;;  %20 = sbr.rel (!%p18_p11) target bundleno = 8 (0x8), region = 84 }
 0x10f   :  { %401 = vsyncpa [#allocation4], 1 }
 0x110   :  { %403 = vsyncpa [#allocation4 + $0x1], 1 }
 0x111   :  { %404 = vsyncpa [#allocation5], 1 }
 0x112   :  { %406 = vsyncpa [#allocation5 + $0x1], 1 }
 0x113   :  { %407 = vsyncpa [#allocation6], 1 }
 0x114   :  { %409 = vsyncpa [#allocation6 + $0x1], 1 }

</bundles_post_ra>
